<compile_context>
chip_gen: v5e
topology: v5e:2x2
jax: 0.10.0
libtpu: 0.0.40
codegen_flags: <defaults>
</compile_context>

<pallas_src>
import functools

import jax
import jax.numpy as jnp
from jax.experimental import pallas as pl
from jax.experimental.pallas import tpu as pltpu

LANE = 128
SUBLANE = 8


def _round_up(n, m):
    return ((n + m - 1) // m) * m


def _pad2(a, rows, cols):
    r, c = a.shape
    return jnp.pad(a, ((0, rows - r), (0, cols - c)))


def qnetwork_kernel(x_ref,
                    we_ref, be_ref,      # encoder Linear
                    w1_ref, b1_ref,      # qf trunk Linear 1
                    w2_ref, b2_ref,      # qf trunk Linear 2
                    w3_ref, b3_ref,      # qf trunk Linear 3
                    out_ref,
                    *, num_actions):
    cd = we_ref.dtype  # compute dtype for MXU inputs (bf16 by default)

    # x arrives f32 and unpadded on its feature axis (K = obs); cast rides in VPU slack.
    x = x_ref[...].astype(cd)

    # encoder + F.relu   (f32 accumulation, bias/ReLU in f32, re-cast for next dot)
    h = jnp.dot(x, we_ref[...], preferred_element_type=jnp.float32) + be_ref[...]
    h = jnp.maximum(h, 0.0).astype(cd)

    # QFunction trunk: Linear -> ReLU -> Linear -> ReLU -> Linear
    h = jnp.dot(h, w1_ref[...], preferred_element_type=jnp.float32) + b1_ref[...]
    h = jnp.maximum(h, 0.0).astype(cd)
    h = jnp.dot(h, w2_ref[...], preferred_element_type=jnp.float32) + b2_ref[...]
    h = jnp.maximum(h, 0.0).astype(cd)
    q = jnp.dot(h, w3_ref[...], preferred_element_type=jnp.float32) + b3_ref[...]

    # Only the real action columns go back to HBM (masked store, ~21x less writeback).
    out_ref[...] = q[:, :num_actions]


def prepare_params(params, compute_dtype=jnp.bfloat16):
    """Pad feature dims to 128 lanes and cast ONCE (outside the per-call forward path).

    Encoder input dim (obs) is left unpadded so x never needs lane padding.
    Returns (padded_param_dict, num_actions).
    """
    obs, enc = params["we"].shape
    hid = params["w1"].shape[1]
    A = params["w3"].shape[1]
    enc_p = _round_up(enc, LANE)
    hid_p = _round_up(hid, LANE)
    a_p = _round_up(A, LANE)
    f32 = jnp.float32

    packed = dict(
        we=_pad2(params["we"], obs, enc_p).astype(compute_dtype),
        be=_pad2(params["be"], 1, enc_p).astype(f32),
        w1=_pad2(params["w1"], enc_p, hid_p).astype(compute_dtype),
        b1=_pad2(params["b1"], 1, hid_p).astype(f32),
        w2=_pad2(params["w2"], hid_p, hid_p).astype(compute_dtype),
        b2=_pad2(params["b2"], 1, hid_p).astype(f32),
        w3=_pad2(params["w3"], hid_p, a_p).astype(compute_dtype),
        b3=_pad2(params["b3"], 1, a_p).astype(f32),
    )
    return packed, A


def qnetwork_forward(x, packed_params, num_actions, *, block_batch=1024):
    """x: (B, obs_dim) float32. packed_params: output of prepare_params."""
    B, obs = x.shape
    A = num_actions

    # Tile selection: fewest steps of <= block_batch rows that evenly split the batch,
    # but keep >= 2 grid steps for mid/large batches so both v7x TensorCores get work.
    n_steps = pl.cdiv(B, block_batch)
    if B >= 64:
        n_steps = max(n_steps, 2)
    tb = _round_up(pl.cdiv(B, n_steps), SUBLANE)
    Bp = n_steps * tb
    if Bp != B:
        x = jnp.pad(x, ((0, Bp - B), (0, 0)))   # batch-only padding (no lane padding)

    weights = tuple(packed_params[k] for k in
                    ("we", "be", "w1", "b1", "w2", "b2", "w3", "b3"))

    def tiled(shape):       # batch-tiled operand (x, out)
        return pl.BlockSpec(shape, lambda i: (i, 0),
                            memory_space=pltpu.MemorySpace.VMEM)

    def resident(a):        # weights/biases: same block every iteration -> VMEM-resident
        return pl.BlockSpec(a.shape, lambda i: (0, 0),
                            memory_space=pltpu.MemorySpace.VMEM)

    enc_p = weights[0].shape[1]
    hid_p = weights[2].shape[1]
    a_p = weights[6].shape[1]
    flops = 2 * Bp * (obs * enc_p + enc_p * hid_p + hid_p * hid_p + hid_p * a_p)
    weight_bytes = sum(int(a.size) * a.dtype.itemsize for a in weights)
    bytes_accessed = Bp * obs * 4 + Bp * A * 4 + weight_bytes   # real HBM footprint
    cost = pl.CostEstimate(flops=flops, transcendentals=0,
                           bytes_accessed=bytes_accessed)

    out = pl.pallas_call(
        functools.partial(qnetwork_kernel, num_actions=A),
        out_shape=jax.ShapeDtypeStruct((Bp, A), jnp.float32),
        grid=(n_steps,),
        in_specs=[tiled((tb, obs))] + [resident(a) for a in weights],
        out_specs=tiled((tb, A)),
        compiler_params=pltpu.CompilerParams(
            dimension_semantics=("parallel",)),
        cost_estimate=cost,
    )(x, *weights)

    return out[:B]


def init_params(key, obs_dim, enc_out, num_features, num_actions):
    """Deterministic PyTorch-style (uniform +-1/sqrt(fan_in)) init, weights as (in,out)."""
    def linear(k, fan_in, fan_out):
        kw, kb = jax.random.split(k)
        bound = 1.0 / jnp.sqrt(fan_in)
        w = jax.random.uniform(kw, (fan_in, fan_out), jnp.float32, -bound, bound)
        b = jax.random.uniform(kb, (1, fan_out), jnp.float32, -bound, bound)
        return w, b

    k0, k1, k2, k3 = jax.random.split(key, 4)
    we, be = linear(k0, obs_dim, enc_out)
    w1, b1 = linear(k1, enc_out, num_features)
    w2, b2 = linear(k2, num_features, num_features)
    w3, b3 = linear(k3, num_features, num_actions)
    return dict(we=we, be=be, w1=w1, b1=b1, w2=w2, b2=b2, w3=w3, b3=b3)


def reference_forward(x, p, compute_dtype=jnp.bfloat16):
    """Pure-JAX reference using the same bf16-matmul / f32-accumulate scheme."""
    cd = compute_dtype

    def layer(h, w, b, relu):
        y = jnp.dot(h.astype(cd), w.astype(cd),
                    preferred_element_type=jnp.float32) + b.astype(jnp.float32)
        return jnp.maximum(y, 0.0) if relu else y

    h = layer(x, p["we"], p["be"], True)
    h = layer(h, p["w1"], p["b1"], True)
    h = layer(h, p["w2"], p["b2"], True)
    return layer(h, p["w3"], p["b3"], False)


if __name__ == "__main__":
    # Small, module-consistent shapes; B large enough to exercise batch tiling
    # (non-128-multiple feature dims exercise the lane-padding / narrow-output paths).
    B, OBS, ENC_OUT, HIDDEN, ACTIONS = 512, 24, 64, 128, 6

    key = jax.random.PRNGKey(0)
    k_x, k_p = jax.random.split(key)

    x = jax.random.normal(k_x, (B, OBS), jnp.float32)
    params = init_params(k_p, OBS, ENC_OUT, HIDDEN, ACTIONS)

    # Pad + cast the weights exactly once (outside the forward path).
    packed_params, num_actions = prepare_params(params)

    out = qnetwork_forward(x, packed_params, num_actions, block_batch=1024)
    out = jax.block_until_ready(out)

    ref = reference_forward(x, params)
    assert out.shape == (B, ACTIONS)
    assert jnp.allclose(out, ref, atol=1e-2, rtol=1e-2), (
        float(jnp.max(jnp.abs(out - ref))))

    print("KERNEL_OK")
</pallas_src>

<mosaic_0001>
module attributes {stable_mosaic.version = 11 : i64} {
  func.func @qnetwork_kernel(%arg0: i32, %arg1: memref<256x24xf32, #tpu.memory_space<vmem>>, %arg2: memref<24x128xbf16, #tpu.memory_space<vmem>>, %arg3: memref<1x128xf32, #tpu.memory_space<vmem>>, %arg4: memref<128x128xbf16, #tpu.memory_space<vmem>>, %arg5: memref<1x128xf32, #tpu.memory_space<vmem>>, %arg6: memref<128x128xbf16, #tpu.memory_space<vmem>>, %arg7: memref<1x128xf32, #tpu.memory_space<vmem>>, %arg8: memref<128x128xbf16, #tpu.memory_space<vmem>>, %arg9: memref<1x128xf32, #tpu.memory_space<vmem>>, %arg10: memref<256x6xf32, #tpu.memory_space<vmem>>) attributes {dimension_semantics = [#tpu.dimension_semantics<parallel>], iteration_bounds = array<i64: 2>, scalar_prefetch = 0 : i64, scratch_operands = 0 : i64, tpu.core_type = #tpu.core_type<tc>, window_params = [{transform_indices = @transform_0, window_bounds = array<i64: 256, 24>}, {pipeline_mode = #tpu.pipeline_mode<synchronous>, transform_indices = @transform_1, window_bounds = array<i64: 24, 128>}, {pipeline_mode = #tpu.pipeline_mode<synchronous>, transform_indices = @transform_2, window_bounds = array<i64: 1, 128>}, {pipeline_mode = #tpu.pipeline_mode<synchronous>, transform_indices = @transform_3, window_bounds = array<i64: 128, 128>}, {pipeline_mode = #tpu.pipeline_mode<synchronous>, transform_indices = @transform_4, window_bounds = array<i64: 1, 128>}, {pipeline_mode = #tpu.pipeline_mode<synchronous>, transform_indices = @transform_5, window_bounds = array<i64: 128, 128>}, {pipeline_mode = #tpu.pipeline_mode<synchronous>, transform_indices = @transform_6, window_bounds = array<i64: 1, 128>}, {pipeline_mode = #tpu.pipeline_mode<synchronous>, transform_indices = @transform_7, window_bounds = array<i64: 128, 128>}, {pipeline_mode = #tpu.pipeline_mode<synchronous>, transform_indices = @transform_8, window_bounds = array<i64: 1, 128>}, {transform_indices = @transform_9, window_bounds = array<i64: 256, 6>}]} {
    %c0 = arith.constant 0 : index
    %c0_0 = arith.constant 0 : index
    %0 = vector.load %arg1[%c0, %c0_0] : memref<256x24xf32, #tpu.memory_space<vmem>>, vector<256x24xf32>
    %1 = arith.truncf %0 : vector<256x24xf32> to vector<256x24xbf16>
    %c0_1 = arith.constant 0 : index
    %c0_2 = arith.constant 0 : index
    %2 = vector.load %arg2[%c0_1, %c0_2] : memref<24x128xbf16, #tpu.memory_space<vmem>>, vector<24x128xbf16>
    %cst = arith.constant dense<0.000000e+00> : vector<256x128xf32>
    %3 = tpu.matmul %1, %2, %cst {dimension_numbers = #tpu.dot_dimension_numbers<[1], [0], [0], [1], [0, 0, 1, 1], [], []>} : vector<256x24xbf16>, vector<24x128xbf16>, vector<256x128xf32> -> vector<256x128xf32>
    %c0_3 = arith.constant 0 : index
    %c0_4 = arith.constant 0 : index
    %4 = vector.load %arg3[%c0_3, %c0_4] : memref<1x128xf32, #tpu.memory_space<vmem>>, vector<1x128xf32>
    %5 = vector.broadcast %4 : vector<1x128xf32> to vector<256x128xf32>
    %6 = arith.addf %3, %5 : vector<256x128xf32>
    %cst_5 = arith.constant 0.000000e+00 : f32
    %7 = vector.broadcast %cst_5 : f32 to vector<256x128xf32>
    %8 = arith.maximumf %6, %7 : vector<256x128xf32>
    %9 = arith.truncf %8 : vector<256x128xf32> to vector<256x128xbf16>
    %c0_6 = arith.constant 0 : index
    %c0_7 = arith.constant 0 : index
    %10 = vector.load %arg4[%c0_6, %c0_7] : memref<128x128xbf16, #tpu.memory_space<vmem>>, vector<128x128xbf16>
    %cst_8 = arith.constant dense<0.000000e+00> : vector<256x128xf32>
    %11 = tpu.matmul %9, %10, %cst_8 {dimension_numbers = #tpu.dot_dimension_numbers<[1], [0], [0], [1], [0, 0, 1, 1], [], []>} : vector<256x128xbf16>, vector<128x128xbf16>, vector<256x128xf32> -> vector<256x128xf32>
    %c0_9 = arith.constant 0 : index
    %c0_10 = arith.constant 0 : index
    %12 = vector.load %arg5[%c0_9, %c0_10] : memref<1x128xf32, #tpu.memory_space<vmem>>, vector<1x128xf32>
    %13 = vector.broadcast %12 : vector<1x128xf32> to vector<256x128xf32>
    %14 = arith.addf %11, %13 : vector<256x128xf32>
    %cst_11 = arith.constant 0.000000e+00 : f32
    %15 = vector.broadcast %cst_11 : f32 to vector<256x128xf32>
    %16 = arith.maximumf %14, %15 : vector<256x128xf32>
    %17 = arith.truncf %16 : vector<256x128xf32> to vector<256x128xbf16>
    %c0_12 = arith.constant 0 : index
    %c0_13 = arith.constant 0 : index
    %18 = vector.load %arg6[%c0_12, %c0_13] : memref<128x128xbf16, #tpu.memory_space<vmem>>, vector<128x128xbf16>
    %cst_14 = arith.constant dense<0.000000e+00> : vector<256x128xf32>
    %19 = tpu.matmul %17, %18, %cst_14 {dimension_numbers = #tpu.dot_dimension_numbers<[1], [0], [0], [1], [0, 0, 1, 1], [], []>} : vector<256x128xbf16>, vector<128x128xbf16>, vector<256x128xf32> -> vector<256x128xf32>
    %c0_15 = arith.constant 0 : index
    %c0_16 = arith.constant 0 : index
    %20 = vector.load %arg7[%c0_15, %c0_16] : memref<1x128xf32, #tpu.memory_space<vmem>>, vector<1x128xf32>
    %21 = vector.broadcast %20 : vector<1x128xf32> to vector<256x128xf32>
    %22 = arith.addf %19, %21 : vector<256x128xf32>
    %cst_17 = arith.constant 0.000000e+00 : f32
    %23 = vector.broadcast %cst_17 : f32 to vector<256x128xf32>
    %24 = arith.maximumf %22, %23 : vector<256x128xf32>
    %25 = arith.truncf %24 : vector<256x128xf32> to vector<256x128xbf16>
    %c0_18 = arith.constant 0 : index
    %c0_19 = arith.constant 0 : index
    %26 = vector.load %arg8[%c0_18, %c0_19] : memref<128x128xbf16, #tpu.memory_space<vmem>>, vector<128x128xbf16>
    %cst_20 = arith.constant dense<0.000000e+00> : vector<256x128xf32>
    %27 = tpu.matmul %25, %26, %cst_20 {dimension_numbers = #tpu.dot_dimension_numbers<[1], [0], [0], [1], [0, 0, 1, 1], [], []>} : vector<256x128xbf16>, vector<128x128xbf16>, vector<256x128xf32> -> vector<256x128xf32>
    %c0_21 = arith.constant 0 : index
    %c0_22 = arith.constant 0 : index
    %28 = vector.load %arg9[%c0_21, %c0_22] : memref<1x128xf32, #tpu.memory_space<vmem>>, vector<1x128xf32>
    %29 = vector.broadcast %28 : vector<1x128xf32> to vector<256x128xf32>
    %30 = arith.addf %27, %29 : vector<256x128xf32>
    %31 = vector.extract_strided_slice %30 {offsets = [0, 0], sizes = [256, 6], strides = [1, 1]} : vector<256x128xf32> to vector<256x6xf32>
    %c0_23 = arith.constant 0 : index
    %c0_24 = arith.constant 0 : index
    %32 = vector.load %arg10[%c0_23, %c0_24] : memref<256x6xf32, #tpu.memory_space<vmem>>, vector<256x6xf32>
    tpu.vector_store %arg10[%c0_23, %c0_24], %31 {strides = array<i32>} : memref<256x6xf32, #tpu.memory_space<vmem>>, vector<256x6xf32>,
    return
  }
  func.func @transform_0(%arg0: i32) -> (i32, i32) {
    %c0_i32 = arith.constant 0 : i32
    %c0_i32_0 = arith.constant 0 : i32
    return %arg0, %c0_i32 : i32, i32
  }
  func.func @transform_1(%arg0: i32) -> (i32, i32) {
    %c0_i32 = arith.constant 0 : i32
    %c0_i32_0 = arith.constant 0 : i32
    %c0_i32_1 = arith.constant 0 : i32
    return %c0_i32, %c0_i32_0 : i32, i32
  }
  func.func @transform_2(%arg0: i32) -> (i32, i32) {
    %c0_i32 = arith.constant 0 : i32
    %c0_i32_0 = arith.constant 0 : i32
    %c0_i32_1 = arith.constant 0 : i32
    return %c0_i32, %c0_i32_0 : i32, i32
  }
  func.func @transform_3(%arg0: i32) -> (i32, i32) {
    %c0_i32 = arith.constant 0 : i32
    %c0_i32_0 = arith.constant 0 : i32
    %c0_i32_1 = arith.constant 0 : i32
    return %c0_i32, %c0_i32_0 : i32, i32
  }
  func.func @transform_4(%arg0: i32) -> (i32, i32) {
    %c0_i32 = arith.constant 0 : i32
    %c0_i32_0 = arith.constant 0 : i32
    %c0_i32_1 = arith.constant 0 : i32
    return %c0_i32, %c0_i32_0 : i32, i32
  }
  func.func @transform_5(%arg0: i32) -> (i32, i32) {
    %c0_i32 = arith.constant 0 : i32
    %c0_i32_0 = arith.constant 0 : i32
    %c0_i32_1 = arith.constant 0 : i32
    return %c0_i32, %c0_i32_0 : i32, i32
  }
  func.func @transform_6(%arg0: i32) -> (i32, i32) {
    %c0_i32 = arith.constant 0 : i32
    %c0_i32_0 = arith.constant 0 : i32
    %c0_i32_1 = arith.constant 0 : i32
    return %c0_i32, %c0_i32_0 : i32, i32
  }
  func.func @transform_7(%arg0: i32) -> (i32, i32) {
    %c0_i32 = arith.constant 0 : i32
    %c0_i32_0 = arith.constant 0 : i32
    %c0_i32_1 = arith.constant 0 : i32
    return %c0_i32, %c0_i32_0 : i32, i32
  }
  func.func @transform_8(%arg0: i32) -> (i32, i32) {
    %c0_i32 = arith.constant 0 : i32
    %c0_i32_0 = arith.constant 0 : i32
    %c0_i32_1 = arith.constant 0 : i32
    return %c0_i32, %c0_i32_0 : i32, i32
  }
  func.func @transform_9(%arg0: i32) -> (i32, i32) {
    %c0_i32 = arith.constant 0 : i32
    %c0_i32_0 = arith.constant 0 : i32
    return %arg0, %c0_i32 : i32, i32
  }
}

</mosaic_0001>

<bundles_post_ra>
// kernel: tpu_custom_call.1
= control target key start
LH: loop header
LB: loop body
LE: loop exit
PB: predicated region body
PF: predicated region fallthrough
CT: control target
= control target key end

     0   :  { %s1469_s30 = smov 0   ;;  %s1835_s0 = inlined_call_operand.vmem [shape: f32[512,24], index: 0, kind: input, shape index: {}]   ;;  %s1836_s1 = inlined_call_operand.vmem [shape: bf16[24,128], index: 1, kind: input, shape index: {}]   ;;  %s1837_s2 = inlined_call_operand.vmem [shape: f32[1,128], index: 2, kind: input, shape index: {}]   ;;  %s1838_s3 = inlined_call_operand.vmem [shape: bf16[128,128], index: 3, kind: input, shape index: {}]   ;;  %s1839_s4 = inlined_call_operand.vmem [shape: f32[1,128], index: 4, kind: input, shape index: {}]   ;;  %s1840_s5 = inlined_call_operand.vmem [shape: bf16[128,128], index: 5, kind: input, shape index: {}]   ;;  %s1841_s6 = inlined_call_operand.vmem [shape: f32[1,128], index: 6, kind: input, shape index: {}]   ;;  %s1842_s7 = inlined_call_operand.vmem [shape: bf16[128,128], index: 7, kind: input, shape index: {}]   ;;  %s1843_s8 = inlined_call_operand.vmem [shape: f32[1,128], index: 8, kind: input, shape index: {}]   ;;  %s1844_s9 = inlined_call_operand.vmem [shape: f32[512,6], index: 9, kind: output, shape index: {}]  }
   0x1 LB: > { %s1247_s10 = sadd.s32 4294967295, %s1417_s30   ;;  %p1251_p0 = scmp.ge.s32.totalorder %s1417_s30, 1  ;;  %s1417_s30 = sphi %s1469_s30, %s19_s30  }
   0x2   : > { %p288_p1 = scmp.lt.s32.totalorder %s1417_s30, 3 }
   0x4   : > { %p289_p2 = pnand %p1251_p0, %p288_p1 }
   0x5   : > { %s1252_s13 = sshll.u32 (!%p289_p2), %s1247_s10, 5 }
   0x6   : > { %292 = sbr.rel (%p289_p2) target bundleno = 833 (0x341), region = 56  ;;  %p325_p3 = scmp.lt.s32.totalorder (!%p289_p2), %s1252_s13, 63 }
   0xb   : > { %v387_v0 = vld [vmem:[%s1836_s1 + $0x8] sm:$0xf]  ;;  %vm450_vm0 = vcmask 1043456   ;;  %s1846_s13 = smov (!%p325_p3, %s1252_s13), 63  ;;  %v1374_v4 = vld [vmem:[%s1836_s1] sm:$0xff]  ;;  %vm401_vm1 = vcmask 195584  }
   0xc   : > { %v397_v1 = vunpack.c.l.b16 %v387_v0  ;;  %s1253_s14 = sshll.u32 %s1846_s13, 3  ;;  %v1382_v20 = vld [vmem:[%s1838_s3 + $0x38] sm:$0xff]  ;;  %v1381_v24 = vld [vmem:[%s1838_s3 + $0x30] sm:$0xff]  ;;  %v1380_v25 = vld [vmem:[%s1838_s3 + $0x28] sm:$0xff]  ;;  %vm1158_vm2 = vcmask 48128  }
   0xd   : > { %s1491_s19 = scalar_lea.vmem %s1835_s0, %s1253_s14  ;;  %659 = vmatpush.bf16.msra.mxu1 %v1382_v20  ;;  %v1379_v26 = vld [vmem:[%s1838_s3 + $0x20] sm:$0xff]  ;;  %v1378_v29 = vld [vmem:[%s1838_s3 + $0x18] sm:$0xff]  ;;  %v1377_v31 = vld [vmem:[%s1838_s3 + $0x10] sm:$0xff]  ;;  %s1720_s25 = scalar_lea.vmem %s1844_s9, %s1253_s14 }
   0xe   : > { %v399_v2 = vpack.c.b16 %v397_v1, %v397_v1  ;;  %v337_v5 = vld [vmem:[%s1491_s19] sm:$0xff]  ;;  %v338_v6 = vld [vmem:[%s1491_s19 + $0x8] sm:$0xff]  ;;  %v339_v8 = vld [vmem:[%s1491_s19 + $0x10] sm:$0xff] }
   0xf   : > { %v369_v7 = vpack.c.bf16 %v338_v6, %v337_v5  ;;  %v340_v9 = vld [vmem:[%s1491_s19 + $0x18] sm:$0xff]  ;;  %v341_v11 = vld [vmem:[%s1491_s19 + $0x20] sm:$0xff]  ;;  %v342_v12 = vld [vmem:[%s1491_s19 + $0x28] sm:$0xff] }
  0x10   : > { %v452_v3 = vsel %vm450_vm0, %v399_v2, 0  ;;  %v370_v10 = vpack.c.bf16 %v340_v9, %v339_v8  ;;  %v371_v13 = vpack.c.bf16 %v342_v12, %v341_v11  ;;  %v343_v14 = vld [vmem:[%s1491_s19 + $0x30] sm:$0xff]  ;;  %v344_v15 = vld [vmem:[%s1491_s19 + $0x38] sm:$0xff]  ;;  %v345_v17 = vld [vmem:[%s1491_s19 + $0x40] sm:$0xff] }
  0x11   : > { %460 = vmatpush.bf16.msra.mxu0 %v452_v3  ;;  %v372_v16 = vpack.c.bf16 %v344_v15, %v343_v14  ;;  %v346_v18 = vld [vmem:[%s1491_s19 + $0x48] sm:$0xff]  ;;  %v347_v21 = vld [vmem:[%s1491_s19 + $0x50] sm:$0xff]  ;;  %v348_v22 = vld [vmem:[%s1491_s19 + $0x58] sm:$0xff]  ;;  %660 = vmatpush.bf16.msra.mxu1 %v1381_v24 }
  0x12   : > { %v373_v19 = vpack.c.bf16 %v346_v18, %v345_v17  ;;  %v374_v23 = vpack.c.bf16 %v348_v22, %v347_v21  ;;  %v349_v27 = vld [vmem:[%s1491_s19 + $0x60] sm:$0xff]  ;;  %v350_v28 = vld [vmem:[%s1491_s19 + $0x68] sm:$0xff]  ;;  %v351_v34 = vld [vmem:[%s1491_s19 + $0x70] sm:$0xff] }
  0x13   : > { %v375_v30 = vpack.c.bf16 %v350_v28, %v349_v27  ;;  %v1376_v32 = vld [vmem:[%s1838_s3 + $0x8] sm:$0xff]  ;;  %v1375_v33 = vld [vmem:[%s1838_s3] sm:$0xff]  ;;  %v352_v35 = vld [vmem:[%s1491_s19 + $0x78] sm:$0xff] }
  0x14   : > { %v376_v36 = vpack.c.bf16 %v352_v35, %v351_v34  ;;  %v353_v37 = vld [vmem:[%s1491_s19 + $0x80] sm:$0xff]  ;;  %v354_v38 = vld [vmem:[%s1491_s19 + $0x88] sm:$0xff]  ;;  %v355_v47 = vld [vmem:[%s1491_s19 + $0x90] sm:$0xff] }
  0x15   : > { %461 = vmatpush.bf16.msra.mxu0 %v1374_v4  ;;  %661 = vmatpush.bf16.msra.mxu1 %v1380_v25  ;;  %v377_v39 = vpack.c.bf16 %v354_v38, %v353_v37  ;;  %v1546_v41 = vld [vmem:[%s1837_s2] ss:$0 sm:$0xff]  ;;  %v356_v48 = vld [vmem:[%s1491_s19 + $0x98] sm:$0xff]  ;;  %v358_v58 = vld [vmem:[%s1491_s19 + $0xa8] sm:$0xff] }
  0x16   : > { %v378_v50 = vpack.c.bf16 %v356_v48, %v355_v47  ;;  %v357_v57 = vld [vmem:[%s1491_s19 + $0xa0] sm:$0xff]  ;;  %v359_v3 = vld [vmem:[%s1491_s19 + $0xb0] sm:$0xff]  ;;  %v360_v4 = vld [vmem:[%s1491_s19 + $0xb8] sm:$0xff] }
  0x17   : > { %v379_v60 = vpack.c.bf16 %v358_v58, %v357_v57  ;;  %v380_v6 = vpack.c.bf16 %v360_v4, %v359_v3  ;;  %v362_v14 = vld [vmem:[%s1491_s19 + $0xc8] sm:$0xff]  ;;  %v364_v24 = vld [vmem:[%s1491_s19 + $0xd8] sm:$0xff]  ;;  %v365_v34 = vld [vmem:[%s1491_s19 + $0xe0] sm:$0xff] }
  0x18   : > { %1260 = vmatmul.msk.bf16.vlgmr.msra.gmra.mxu0 %vm401_vm1, %v369_v7  ;;  %v366_v35 = vld [vmem:[%s1491_s19 + $0xe8] sm:$0xff]  ;;  %v1389_v37 = vld [vmem:[%s1840_s5 + $0x30] sm:$0xff] }
  0x19   : > { %662 = vmatpush.bf16.msra.mxu1 %v1379_v26  ;;  %v383_v38 = vpack.c.bf16 %v366_v35, %v365_v34 }
  0x1d   : > { %663 = vmatpush.bf16.msra.mxu1 %v1378_v29 }
  0x21   : > { %664 = vmatpush.bf16.msra.mxu1 %v1377_v31  ;;  %v1390_v31 = vld [vmem:[%s1840_s5 + $0x38] sm:$0xff] }
  0x22   : > { %864 = vmatpush.bf16.msra.mxu2 %v1390_v31 }
  0x25   : > { %665 = vmatpush.bf16.msra.mxu1 %v1376_v32 }
  0x26   : > { %865 = vmatpush.bf16.msra.mxu2 %v1389_v37 }
  0x28   : > { %1261 = vmatmul.msk.bf16.gmra.mxu0 %vm401_vm1, %v370_v10 }
  0x29   : > { %666 = vmatpush.bf16.msra.mxu1 %v1375_v33 }
  0x38   : > { %1262 = vmatmul.msk.bf16.gmra.mxu0 %vm401_vm1, %v371_v13  ;;  %v361_v13 = vld [vmem:[%s1491_s19 + $0xc0] sm:$0xff] }
  0x48   : > { %1263 = vmatmul.msk.bf16.gmra.mxu0 %vm401_vm1, %v372_v16  ;;  %v381_v16 = vpack.c.bf16 %v362_v14, %v361_v13 }
  0x58   : > { %1264 = vmatmul.msk.bf16.gmra.mxu0 %vm401_vm1, %v373_v19 }
  0x68   : > { %1265 = vmatmul.msk.bf16.gmra.mxu0 %vm401_vm1, %v374_v23  ;;  %v363_v23 = vld [vmem:[%s1491_s19 + $0xd0] sm:$0xff] }
  0x69   : > { %v382_v26 = vpack.c.bf16 %v364_v24, %v363_v23 }
  0x78   : > { %1266 = vmatmul.msk.bf16.gmra.mxu0 %vm401_vm1, %v375_v30 }
  0x88   : > { %1267 = vmatmul.msk.bf16.gmra.mxu0 %vm401_vm1, %v376_v36 }
  0x95   : > { %v463_v40 = vpop.f32.mrf.mxu0 }
  0x96   : > { %v464_v42 = vadd.f32 %v1546_v41, %v463_v40  ;;  %v1388_v40 = vld [vmem:[%s1840_s5 + $0x28] sm:$0xff] }
  0x97   : > { %866 = vmatpush.bf16.msra.mxu2 %v1388_v40 }
  0x98   : > { %1268 = vmatmul.msk.bf16.gmra.mxu0 %vm401_vm1, %v377_v39  ;;  %v543_v45 = vmax.f32 %v464_v42, 0.0  ;;  %v1387_v42 = vld [vmem:[%s1840_s5 + $0x20] sm:$0xff] }
  0x9b   : > { %867 = vmatpush.bf16.msra.mxu2 %v1387_v42 }
  0x9d   : > { %v465_v43 = vpop.f32.mrf.mxu0 }
  0x9e   : > { %v466_v44 = vadd.f32 %v1546_v41, %v465_v43 }
  0xa0   : > { %v544_v46 = vmax.f32 %v466_v44, 0.0 }
  0xa2   : > { %v575_v49 = vpack.c.bf16 %v544_v46, %v543_v45  ;;  %v1386_v46 = vld [vmem:[%s1840_s5 + $0x18] sm:$0xff] }
  0xa3   : > { %868 = vmatpush.bf16.msra.mxu2 %v1386_v46 }
  0xa4   : > { %667 = vmatmul.bf16.vlgmr.msra.gmra.mxu1 %v575_v49  ;;  %v367_v49 = vld [vmem:[%s1491_s19 + $0xf0] sm:$0xff] }
  0xa5   : > { %v468_v51 = vpop.f32.mrf.mxu0 }
  0xa6   : > { %v469_v52 = vadd.f32 %v1546_v41, %v468_v51 }
  0xa8   : > { %1269 = vmatmul.msk.bf16.gmra.mxu0 %vm401_vm1, %v378_v50  ;;  %v545_v55 = vmax.f32 %v469_v52, 0.0  ;;  %v368_v50 = vld [vmem:[%s1491_s19 + $0xf8] sm:$0xff]  ;;  %v1385_v52 = vld [vmem:[%s1840_s5 + $0x10] sm:$0xff] }
  0xa9   : > { %869 = vmatpush.bf16.msra.mxu2 %v1385_v52 }
  0xad   : > { %v470_v53 = vpop.f32.mrf.mxu0 }
  0xae   : > { %v471_v54 = vadd.f32 %v1546_v41, %v470_v53  ;;  %v384_v53 = vpack.c.bf16 %v368_v50, %v367_v49 }
  0xb0   : > { %v546_v56 = vmax.f32 %v471_v54, 0.0 }
  0xb2   : > { %v576_v59 = vpack.c.bf16 %v546_v56, %v545_v55  ;;  %v1384_v55 = vld [vmem:[%s1840_s5 + $0x8] sm:$0xff]  ;;  %v1383_v56 = vld [vmem:[%s1840_s5] sm:$0xff] }
  0xb3   : > { %870 = vmatpush.bf16.msra.mxu2 %v1384_v55 }
  0xb4   : > { %672 = vmatmul.bf16.gmra.mxu1 %v576_v59 }
  0xb5   : > { %v473_v61 = vpop.f32.mrf.mxu0 }
  0xb6   : > { %v474_v62 = vadd.f32 %v1546_v41, %v473_v61 }
  0xb7   : > { %871 = vmatpush.bf16.msra.mxu2 %v1383_v56 }
  0xb8   : > { %1270 = vmatmul.msk.bf16.gmra.mxu0 %vm401_vm1, %v379_v60  ;;  %v547_v1 = vmax.f32 %v474_v62, 0.0 }
  0xbd   : > { %v475_v63 = vpop.f32.mrf.mxu0 }
  0xbe   : > { %v476_v0 = vadd.f32 %v1546_v41, %v475_v63 }
  0xc0   : > { %v548_v2 = vmax.f32 %v476_v0, 0.0 }
  0xc2   : > { %v577_v5 = vpack.c.bf16 %v548_v2, %v547_v1 }
  0xc4   : > { %677 = vmatmul.bf16.gmra.mxu1 %v577_v5 }
  0xc5   : > { %v478_v7 = vpop.f32.mrf.mxu0 }
  0xc6   : > { %v479_v8 = vadd.f32 %v1546_v41, %v478_v7  ;;  %v1615_v7 = vld [vmem:[%s1839_s4] ss:$0 sm:$0xff] }
  0xc8   : > { %1271 = vmatmul.msk.bf16.gmra.mxu0 %vm401_vm1, %v380_v6  ;;  %v549_v11 = vmax.f32 %v479_v8, 0.0 }
  0xcd   : > { %v480_v9 = vpop.f32.mrf.mxu0 }
  0xce   : > { %v481_v10 = vadd.f32 %v1546_v41, %v480_v9 }
  0xd0   : > { %v550_v12 = vmax.f32 %v481_v10, 0.0 }
  0xd2   : > { %v578_v15 = vpack.c.bf16 %v550_v12, %v549_v11 }
  0xd4   : > { %682 = vmatmul.bf16.gmra.mxu1 %v578_v15 }
  0xd5   : > { %v483_v17 = vpop.f32.mrf.mxu0 }
  0xd6   : > { %v484_v18 = vadd.f32 %v1546_v41, %v483_v17 }
  0xd8   : > { %1272 = vmatmul.msk.bf16.gmra.mxu0 %vm401_vm1, %v381_v16  ;;  %v551_v21 = vmax.f32 %v484_v18, 0.0 }
  0xdd   : > { %v485_v19 = vpop.f32.mrf.mxu0 }
  0xde   : > { %v486_v20 = vadd.f32 %v1546_v41, %v485_v19 }
  0xe0   : > { %v552_v22 = vmax.f32 %v486_v20, 0.0 }
  0xe2   : > { %v579_v25 = vpack.c.bf16 %v552_v22, %v551_v21 }
  0xe4   : > { %687 = vmatmul.bf16.gmra.mxu1 %v579_v25 }
  0xe5   : > { %v488_v27 = vpop.f32.mrf.mxu0 }
  0xe6   : > { %v489_v28 = vadd.f32 %v1546_v41, %v488_v27 }
  0xe8   : > { %1273 = vmatmul.msk.bf16.gmra.mxu0 %vm401_vm1, %v382_v26  ;;  %v553_v32 = vmax.f32 %v489_v28, 0.0 }
  0xed   : > { %v490_v29 = vpop.f32.mrf.mxu0 }
  0xee   : > { %v491_v30 = vadd.f32 %v1546_v41, %v490_v29 }
  0xf0   : > { %v554_v33 = vmax.f32 %v491_v30, 0.0 }
  0xf2   : > { %v580_v36 = vpack.c.bf16 %v554_v33, %v553_v32 }
  0xf4   : > { %692 = vmatmul.bf16.gmra.mxu1 %v580_v36 }
  0xf5   : > { %v493_v39 = vpop.f32.mrf.mxu0 }
  0xf6   : > { %v494_v43 = vadd.f32 %v1546_v41, %v493_v39 }
  0xf8   : > { %1274 = vmatmul.msk.bf16.gmra.mxu0 %vm401_vm1, %v383_v38  ;;  %v555_v47 = vmax.f32 %v494_v43, 0.0 }
  0xfd   : > { %v495_v44 = vpop.f32.mrf.mxu0 }
  0xfe   : > { %v496_v45 = vadd.f32 %v1546_v41, %v495_v44 }
 0x100   : > { %v556_v48 = vmax.f32 %v496_v45, 0.0 }
 0x102   : > { %v581_v51 = vpack.c.bf16 %v556_v48, %v555_v47 }
 0x104   : > { %697 = vmatmul.bf16.gmra.mxu1 %v581_v51 }
 0x105   : > { %v498_v54 = vpop.f32.mrf.mxu0 }
 0x106   : > { %v499_v57 = vadd.f32 %v1546_v41, %v498_v54 }
 0x108   : > { %1275 = vmatmul.msk.bf16.gmra.mxu0 %vm401_vm1, %v384_v53  ;;  %v557_v60 = vmax.f32 %v499_v57, 0.0 }
 0x10d   : > { %v500_v58 = vpop.f32.mrf.mxu0 }
 0x10e   : > { %v501_v59 = vadd.f32 %v1546_v41, %v500_v58 }
 0x110   : > { %v558_v61 = vmax.f32 %v501_v59, 0.0 }
 0x112   : > { %v582_v62 = vpack.c.bf16 %v558_v61, %v557_v60 }
 0x114   : > { %702 = vmatmul.bf16.gmra.mxu1 %v582_v62 }
 0x115   : > { %v503_v63 = vpop.f32.mrf.mxu0 }
 0x116   : > { %v504_v0 = vadd.f32 %v1546_v41, %v503_v63 }
 0x118   : > { %v559_v3 = vmax.f32 %v504_v0, 0.0 }
 0x11d   : > { %v505_v1 = vpop.f32.mrf.mxu0 }
 0x11e   : > { %v506_v2 = vadd.f32 %v1546_v41, %v505_v1 }
 0x120   : > { %v560_v4 = vmax.f32 %v506_v2, 0.0 }
 0x121   : > { %v668_v5 = vpop.f32.mrf.mxu1 }
 0x122   : > { %v583_v6 = vpack.c.bf16 %v560_v4, %v559_v3  ;;  %v669_v9 = vadd.f32 %v1615_v7, %v668_v5 }
 0x124   : > { %707 = vmatmul.bf16.gmra.mxu1 %v583_v6  ;;  %v748_v12 = vmax.f32 %v669_v9, 0.0 }
 0x125   : > { %v508_v8 = vpop.f32.mrf.mxu0 }
 0x126   : > { %v509_v13 = vadd.f32 %v1546_v41, %v508_v8 }
 0x128   : > { %v561_v18 = vmax.f32 %v509_v13, 0.0 }
 0x129   : > { %v670_v10 = vpop.f32.mrf.mxu1 }
 0x12a   : > { %v671_v11 = vadd.f32 %v1615_v7, %v670_v10 }
 0x12c   : > { %v749_v14 = vmax.f32 %v671_v11, 0.0 }
 0x12d   : > { %v510_v15 = vpop.f32.mrf.mxu0 }
 0x12e   : > { %v511_v16 = vadd.f32 %v1546_v41, %v510_v15  ;;  %v780_v17 = vpack.c.bf16 %v749_v14, %v748_v12 }
 0x130   : > { %v562_v19 = vmax.f32 %v511_v16, 0.0  ;;  %872 = vmatmul.bf16.vlgmr.msra.gmra.mxu2 %v780_v17 }
 0x131   : > { %v673_v20 = vpop.f32.mrf.mxu1 }
 0x132   : > { %v584_v21 = vpack.c.bf16 %v562_v19, %v561_v18  ;;  %v674_v23 = vadd.f32 %v1615_v7, %v673_v20 }
 0x134   : > { %712 = vmatmul.bf16.gmra.mxu1 %v584_v21  ;;  %v750_v26 = vmax.f32 %v674_v23, 0.0 }
 0x135   : > { %v513_v22 = vpop.f32.mrf.mxu0 }
 0x136   : > { %v514_v27 = vadd.f32 %v1546_v41, %v513_v22 }
 0x138   : > { %v563_v32 = vmax.f32 %v514_v27, 0.0 }
 0x139   : > { %v675_v24 = vpop.f32.mrf.mxu1 }
 0x13a   : > { %v676_v25 = vadd.f32 %v1615_v7, %v675_v24 }
 0x13c   : > { %v751_v28 = vmax.f32 %v676_v25, 0.0 }
 0x13d   : > { %v515_v29 = vpop.f32.mrf.mxu0 }
 0x13e   : > { %v516_v30 = vadd.f32 %v1546_v41, %v515_v29  ;;  %v781_v31 = vpack.c.bf16 %v751_v28, %v750_v26  ;;  %v1398_v29 = vld [vmem:[%s1842_s7 + $0x38] sm:$0xff] }
 0x13f   : > { %1069 = vmatpush.bf16.msra.mxu3 %v1398_v29 }
 0x140   : > { %v564_v33 = vmax.f32 %v516_v30, 0.0  ;;  %877 = vmatmul.bf16.gmra.mxu2 %v781_v31  ;;  %v1397_v31 = vld [vmem:[%s1842_s7 + $0x30] sm:$0xff] }
 0x141   : > { %v678_v34 = vpop.f32.mrf.mxu1 }
 0x142   : > { %v585_v35 = vpack.c.bf16 %v564_v33, %v563_v32  ;;  %v679_v37 = vadd.f32 %v1615_v7, %v678_v34 }
 0x143   : > { %1070 = vmatpush.bf16.msra.mxu3 %v1397_v31 }
 0x144   : > { %717 = vmatmul.bf16.gmra.mxu1 %v585_v35  ;;  %v752_v40 = vmax.f32 %v679_v37, 0.0  ;;  %v1396_v35 = vld [vmem:[%s1842_s7 + $0x28] sm:$0xff] }
 0x145   : > { %v518_v36 = vpop.f32.mrf.mxu0 }
 0x146   : > { %v519_v42 = vadd.f32 %v1546_v41, %v518_v36 }
 0x147   : > { %1071 = vmatpush.bf16.msra.mxu3 %v1396_v35 }
 0x148   : > { %v565_v47 = vmax.f32 %v519_v42, 0.0 }
 0x149   : > { %v680_v38 = vpop.f32.mrf.mxu1 }
 0x14a   : > { %v681_v39 = vadd.f32 %v1615_v7, %v680_v38 }
 0x14c   : > { %v753_v43 = vmax.f32 %v681_v39, 0.0 }
 0x14d   : > { %v520_v44 = vpop.f32.mrf.mxu0 }
 0x14e   : > { %v521_v45 = vadd.f32 %v1546_v41, %v520_v44  ;;  %v782_v46 = vpack.c.bf16 %v753_v43, %v752_v40  ;;  %v1395_v40 = vld [vmem:[%s1842_s7 + $0x20] sm:$0xff] }
 0x14f   : > { %1072 = vmatpush.bf16.msra.mxu3 %v1395_v40 }
 0x150   : > { %v566_v48 = vmax.f32 %v521_v45, 0.0  ;;  %882 = vmatmul.bf16.gmra.mxu2 %v782_v46 }
 0x151   : > { %v683_v49 = vpop.f32.mrf.mxu1 }
 0x152   : > { %v586_v50 = vpack.c.bf16 %v566_v48, %v565_v47  ;;  %v684_v52 = vadd.f32 %v1615_v7, %v683_v49  ;;  %v1394_v48 = vld [vmem:[%s1842_s7 + $0x18] sm:$0xff] }
 0x153   : > { %1073 = vmatpush.bf16.msra.mxu3 %v1394_v48 }
 0x154   : > { %722 = vmatmul.bf16.gmra.mxu1 %v586_v50  ;;  %v754_v55 = vmax.f32 %v684_v52, 0.0  ;;  %v1393_v50 = vld [vmem:[%s1842_s7 + $0x10] sm:$0xff]  ;;  %v1392_v52 = vld [vmem:[%s1842_s7 + $0x8] sm:$0xff] }
 0x155   : > { %v523_v51 = vpop.f32.mrf.mxu0 }
 0x156   : > { %v524_v56 = vadd.f32 %v1546_v41, %v523_v51 }
 0x157   : > { %1074 = vmatpush.bf16.msra.mxu3 %v1393_v50 }
 0x158   : > { %v567_v61 = vmax.f32 %v524_v56, 0.0  ;;  %v1391_v56 = vld [vmem:[%s1842_s7] sm:$0xff] }
 0x159   : > { %v685_v53 = vpop.f32.mrf.mxu1 }
 0x15a   : > { %v686_v54 = vadd.f32 %v1615_v7, %v685_v53 }
 0x15b   : > { %1075 = vmatpush.bf16.msra.mxu3 %v1392_v52 }
 0x15c   : > { %v755_v57 = vmax.f32 %v686_v54, 0.0 }
 0x15d   : > { %v525_v58 = vpop.f32.mrf.mxu0 }
 0x15e   : > { %v526_v59 = vadd.f32 %v1546_v41, %v525_v58  ;;  %v783_v60 = vpack.c.bf16 %v755_v57, %v754_v55 }
 0x15f   : > { %1076 = vmatpush.bf16.msra.mxu3 %v1391_v56 }
 0x160   : > { %v568_v62 = vmax.f32 %v526_v59, 0.0  ;;  %887 = vmatmul.bf16.gmra.mxu2 %v783_v60 }
 0x161   : > { %v688_v63 = vpop.f32.mrf.mxu1 }
 0x162   : > { %v587_v0 = vpack.c.bf16 %v568_v62, %v567_v61  ;;  %v689_v2 = vadd.f32 %v1615_v7, %v688_v63 }
 0x164   : > { %727 = vmatmul.bf16.gmra.mxu1 %v587_v0  ;;  %v756_v5 = vmax.f32 %v689_v2, 0.0 }
 0x165   : > { %v528_v1 = vpop.f32.mrf.mxu0 }
 0x166   : > { %v529_v6 = vadd.f32 %v1546_v41, %v528_v1 }
 0x168   : > { %v569_v12 = vmax.f32 %v529_v6, 0.0 }
 0x169   : > { %v690_v3 = vpop.f32.mrf.mxu1 }
 0x16a   : > { %v691_v4 = vadd.f32 %v1615_v7, %v690_v3  ;;  %v1676_v3 = vld [vmem:[%s1841_s6] ss:$0 sm:$0xff] }
 0x16c   : > { %v757_v8 = vmax.f32 %v691_v4, 0.0 }
 0x16d   : > { %v530_v9 = vpop.f32.mrf.mxu0 }
 0x16e   : > { %v531_v10 = vadd.f32 %v1546_v41, %v530_v9  ;;  %v784_v11 = vpack.c.bf16 %v757_v8, %v756_v5 }
 0x170   : > { %v570_v13 = vmax.f32 %v531_v10, 0.0  ;;  %892 = vmatmul.bf16.gmra.mxu2 %v784_v11 }
 0x171   : > { %v693_v14 = vpop.f32.mrf.mxu1 }
 0x172   : > { %v588_v15 = vpack.c.bf16 %v570_v13, %v569_v12  ;;  %v694_v17 = vadd.f32 %v1615_v7, %v693_v14 }
 0x174   : > { %732 = vmatmul.bf16.gmra.mxu1 %v588_v15  ;;  %v758_v20 = vmax.f32 %v694_v17, 0.0 }
 0x175   : > { %v533_v16 = vpop.f32.mrf.mxu0 }
 0x176   : > { %v534_v21 = vadd.f32 %v1546_v41, %v533_v16 }
 0x178   : > { %v571_v26 = vmax.f32 %v534_v21, 0.0 }
 0x179   : > { %v695_v18 = vpop.f32.mrf.mxu1 }
 0x17a   : > { %v696_v19 = vadd.f32 %v1615_v7, %v695_v18 }
 0x17c   : > { %v759_v22 = vmax.f32 %v696_v19, 0.0 }
 0x17d   : > { %v535_v23 = vpop.f32.mrf.mxu0 }
 0x17e   : > { %v536_v24 = vadd.f32 %v1546_v41, %v535_v23  ;;  %v785_v25 = vpack.c.bf16 %v759_v22, %v758_v20 }
 0x180   : > { %v572_v27 = vmax.f32 %v536_v24, 0.0  ;;  %897 = vmatmul.bf16.gmra.mxu2 %v785_v25 }
 0x181   : > { %v698_v28 = vpop.f32.mrf.mxu1 }
 0x182   : > { %v589_v30 = vpack.c.bf16 %v572_v27, %v571_v26  ;;  %v699_v33 = vadd.f32 %v1615_v7, %v698_v28 }
 0x184   : > { %737 = vmatmul.bf16.gmra.mxu1 %v589_v30  ;;  %v760_v37 = vmax.f32 %v699_v33, 0.0 }
 0x185   : > { %v538_v32 = vpop.f32.mrf.mxu0 }
 0x186   : > { %v539_v38 = vadd.f32 %v1546_v41, %v538_v32 }
 0x188   : > { %v573_v45 = vmax.f32 %v539_v38, 0.0 }
 0x189   : > { %v700_v34 = vpop.f32.mrf.mxu1 }
 0x18a   : > { %v701_v36 = vadd.f32 %v1615_v7, %v700_v34 }
 0x18c   : > { %v761_v39 = vmax.f32 %v701_v36, 0.0 }
 0x18d   : > { %v540_v42 = vpop.f32.mrf.mxu0 }
 0x18e   : > { %v541_v43 = vadd.f32 %v1546_v41, %v540_v42  ;;  %v786_v44 = vpack.c.bf16 %v761_v39, %v760_v37 }
 0x190   : > { %v574_v46 = vmax.f32 %v541_v43, 0.0  ;;  %902 = vmatmul.bf16.gmra.mxu2 %v786_v44 }
 0x191   : > { %v703_v47 = vpop.f32.mrf.mxu1 }
 0x192   : > { %v590_v49 = vpack.c.bf16 %v574_v46, %v573_v45  ;;  %v704_v41 = vadd.f32 %v1615_v7, %v703_v47 }
 0x194   : > { %742 = vmatmul.bf16.gmra.mxu1 %v590_v49  ;;  %v762_v54 = vmax.f32 %v704_v41, 0.0 }
 0x199   : > { %v705_v51 = vpop.f32.mrf.mxu1 }
 0x19a   : > { %v706_v53 = vadd.f32 %v1615_v7, %v705_v51 }
 0x19c   : > { %v763_v55 = vmax.f32 %v706_v53, 0.0 }
 0x19e   : > { %v787_v57 = vpack.c.bf16 %v763_v55, %v762_v54 }
 0x1a0   : > { %907 = vmatmul.bf16.gmra.mxu2 %v787_v57 }
 0x1a1   : > { %v708_v58 = vpop.f32.mrf.mxu1 }
 0x1a2   : > { %v709_v59 = vadd.f32 %v1615_v7, %v708_v58 }
 0x1a4   : > { %v764_v62 = vmax.f32 %v709_v59, 0.0 }
 0x1a9   : > { %v710_v60 = vpop.f32.mrf.mxu1 }
 0x1aa   : > { %v711_v61 = vadd.f32 %v1615_v7, %v710_v60 }
 0x1ac   : > { %v765_v63 = vmax.f32 %v711_v61, 0.0 }
 0x1ae   : > { %v788_v0 = vpack.c.bf16 %v765_v63, %v764_v62 }
 0x1b0   : > { %912 = vmatmul.bf16.gmra.mxu2 %v788_v0 }
 0x1b1   : > { %v713_v1 = vpop.f32.mrf.mxu1 }
 0x1b2   : > { %v714_v4 = vadd.f32 %v1615_v7, %v713_v1 }
 0x1b3   : > { %v873_v2 = vpop.f32.mrf.mxu2 }
 0x1b4   : > { %v874_v6 = vadd.f32 %v1676_v3, %v873_v2  ;;  %v766_v10 = vmax.f32 %v714_v4, 0.0 }
 0x1b6   : > { %v953_v13 = vmax.f32 %v874_v6, 0.0 }
 0x1b9   : > { %v715_v5 = vpop.f32.mrf.mxu1 }
 0x1ba   : > { %v716_v8 = vadd.f32 %v1615_v7, %v715_v5 }
 0x1bb   : > { %v875_v9 = vpop.f32.mrf.mxu2 }
 0x1bc   : > { %v767_v11 = vmax.f32 %v716_v8, 0.0  ;;  %v876_v12 = vadd.f32 %v1676_v3, %v875_v9 }
 0x1be   : > { %v954_v14 = vmax.f32 %v876_v12, 0.0  ;;  %v789_v15 = vpack.c.bf16 %v767_v11, %v766_v10 }
 0x1c0   : > { %917 = vmatmul.bf16.gmra.mxu2 %v789_v15  ;;  %v985_v16 = vpack.c.bf16 %v954_v14, %v953_v13 }
 0x1c1   : > { %v718_v17 = vpop.f32.mrf.mxu1 }
 0x1c2   : > { %1077 = vmatmul.bf16.vlgmr.msra.gmra.mxu3 %v985_v16  ;;  %v719_v19 = vadd.f32 %v1615_v7, %v718_v17 }
 0x1c3   : > { %v878_v18 = vpop.f32.mrf.mxu2 }
 0x1c4   : > { %v879_v21 = vadd.f32 %v1676_v3, %v878_v18  ;;  %v768_v24 = vmax.f32 %v719_v19, 0.0 }
 0x1c6   : > { %v955_v27 = vmax.f32 %v879_v21, 0.0 }
 0x1c9   : > { %v720_v20 = vpop.f32.mrf.mxu1 }
 0x1ca   : > { %v721_v22 = vadd.f32 %v1615_v7, %v720_v20 }
 0x1cb   : > { %v880_v23 = vpop.f32.mrf.mxu2 }
 0x1cc   : > { %v769_v25 = vmax.f32 %v721_v22, 0.0  ;;  %v881_v26 = vadd.f32 %v1676_v3, %v880_v23 }
 0x1ce   : > { %v956_v28 = vmax.f32 %v881_v26, 0.0  ;;  %v790_v29 = vpack.c.bf16 %v769_v25, %v768_v24 }
 0x1d0   : > { %922 = vmatmul.bf16.gmra.mxu2 %v790_v29  ;;  %v986_v30 = vpack.c.bf16 %v956_v28, %v955_v27 }
 0x1d1   : > { %v723_v31 = vpop.f32.mrf.mxu1 }
 0x1d2   : > { %1082 = vmatmul.bf16.gmra.mxu3 %v986_v30  ;;  %v724_v33 = vadd.f32 %v1615_v7, %v723_v31 }
 0x1d3   : > { %v883_v32 = vpop.f32.mrf.mxu2 }
 0x1d4   : > { %v884_v35 = vadd.f32 %v1676_v3, %v883_v32  ;;  %v770_v38 = vmax.f32 %v724_v33, 0.0 }
 0x1d6   : > { %v957_v42 = vmax.f32 %v884_v35, 0.0 }
 0x1d9   : > { %v725_v34 = vpop.f32.mrf.mxu1 }
 0x1da   : > { %v726_v36 = vadd.f32 %v1615_v7, %v725_v34 }
 0x1db   : > { %v885_v37 = vpop.f32.mrf.mxu2 }
 0x1dc   : > { %v771_v39 = vmax.f32 %v726_v36, 0.0  ;;  %v886_v40 = vadd.f32 %v1676_v3, %v885_v37 }
 0x1de   : > { %v958_v43 = vmax.f32 %v886_v40, 0.0  ;;  %v791_v44 = vpack.c.bf16 %v771_v39, %v770_v38 }
 0x1e0   : > { %927 = vmatmul.bf16.gmra.mxu2 %v791_v44  ;;  %v987_v45 = vpack.c.bf16 %v958_v43, %v957_v42 }
 0x1e1   : > { %v728_v46 = vpop.f32.mrf.mxu1 }
 0x1e2   : > { %1087 = vmatmul.bf16.gmra.mxu3 %v987_v45  ;;  %v729_v48 = vadd.f32 %v1615_v7, %v728_v46 }
 0x1e3   : > { %v888_v47 = vpop.f32.mrf.mxu2 }
 0x1e4   : > { %v889_v50 = vadd.f32 %v1676_v3, %v888_v47  ;;  %v772_v52 = vmax.f32 %v729_v48, 0.0 }
 0x1e6   : > { %v959_v55 = vmax.f32 %v889_v50, 0.0 }
 0x1e9   : > { %v730_v49 = vpop.f32.mrf.mxu1 }
 0x1ea   : > { %v731_v41 = vadd.f32 %v1615_v7, %v730_v49 }
 0x1eb   : > { %v890_v51 = vpop.f32.mrf.mxu2 }
 0x1ec   : > { %v773_v53 = vmax.f32 %v731_v41, 0.0  ;;  %v891_v54 = vadd.f32 %v1676_v3, %v890_v51 }
 0x1ee   : > { %v792_v56 = vpack.c.bf16 %v773_v53, %v772_v52  ;;  %v960_v57 = vmax.f32 %v891_v54, 0.0  ;;  %v1713_v52 = vld [vmem:[%s1843_s8] ss:$0 sm:$0xff] }
 0x1f0   : > { %932 = vmatmul.bf16.gmra.mxu2 %v792_v56  ;;  %v988_v58 = vpack.c.bf16 %v960_v57, %v959_v55 }
 0x1f1   : > { %v733_v59 = vpop.f32.mrf.mxu1 }
 0x1f2   : > { %1092 = vmatmul.bf16.gmra.mxu3 %v988_v58  ;;  %v734_v61 = vadd.f32 %v1615_v7, %v733_v59 }
 0x1f3   : > { %v893_v60 = vpop.f32.mrf.mxu2 }
 0x1f4   : > { %v894_v63 = vadd.f32 %v1676_v3, %v893_v60  ;;  %v774_v2 = vmax.f32 %v734_v61, 0.0 }
 0x1f6   : > { %v961_v6 = vmax.f32 %v894_v63, 0.0 }
 0x1f9   : > { %v735_v62 = vpop.f32.mrf.mxu1 }
 0x1fa   : > { %v736_v0 = vadd.f32 %v1615_v7, %v735_v62 }
 0x1fb   : > { %v895_v1 = vpop.f32.mrf.mxu2 }
 0x1fc   : > { %v775_v4 = vmax.f32 %v736_v0, 0.0  ;;  %v896_v5 = vadd.f32 %v1676_v3, %v895_v1 }
 0x1fe   : > { %v793_v8 = vpack.c.bf16 %v775_v4, %v774_v2  ;;  %v962_v9 = vmax.f32 %v896_v5, 0.0 }
 0x200   : > { %937 = vmatmul.bf16.gmra.mxu2 %v793_v8  ;;  %v989_v10 = vpack.c.bf16 %v962_v9, %v961_v6 }
 0x201   : > { %v738_v11 = vpop.f32.mrf.mxu1 }
 0x202   : > { %1097 = vmatmul.bf16.gmra.mxu3 %v989_v10  ;;  %v739_v13 = vadd.f32 %v1615_v7, %v738_v11 }
 0x203   : > { %v898_v12 = vpop.f32.mrf.mxu2 }
 0x204   : > { %v899_v15 = vadd.f32 %v1676_v3, %v898_v12  ;;  %v776_v18 = vmax.f32 %v739_v13, 0.0 }
 0x206   : > { %v963_v21 = vmax.f32 %v899_v15, 0.0 }
 0x209   : > { %v740_v14 = vpop.f32.mrf.mxu1 }
 0x20a   : > { %v741_v16 = vadd.f32 %v1615_v7, %v740_v14 }
 0x20b   : > { %v900_v17 = vpop.f32.mrf.mxu2 }
 0x20c   : > { %v777_v19 = vmax.f32 %v741_v16, 0.0  ;;  %v901_v20 = vadd.f32 %v1676_v3, %v900_v17 }
 0x20e   : > { %v794_v22 = vpack.c.bf16 %v777_v19, %v776_v18  ;;  %v964_v23 = vmax.f32 %v901_v20, 0.0 }
 0x210   : > { %942 = vmatmul.bf16.gmra.mxu2 %v794_v22  ;;  %v990_v24 = vpack.c.bf16 %v964_v23, %v963_v21 }
 0x211   : > { %v743_v25 = vpop.f32.mrf.mxu1 }
 0x212   : > { %1102 = vmatmul.bf16.gmra.mxu3 %v990_v24  ;;  %v744_v27 = vadd.f32 %v1615_v7, %v743_v25 }
 0x213   : > { %v903_v26 = vpop.f32.mrf.mxu2 }
 0x214   : > { %v904_v29 = vadd.f32 %v1676_v3, %v903_v26  ;;  %v778_v32 = vmax.f32 %v744_v27, 0.0 }
 0x216   : > { %v965_v35 = vmax.f32 %v904_v29, 0.0 }
 0x219   : > { %v745_v28 = vpop.f32.mrf.mxu1 }
 0x21a   : > { %v746_v30 = vadd.f32 %v1615_v7, %v745_v28 }
 0x21b   : > { %v905_v31 = vpop.f32.mrf.mxu2 }
 0x21c   : > { %v779_v33 = vmax.f32 %v746_v30, 0.0  ;;  %v906_v34 = vadd.f32 %v1676_v3, %v905_v31 }
 0x21e   : > { %v795_v36 = vpack.c.bf16 %v779_v33, %v778_v32  ;;  %v966_v37 = vmax.f32 %v906_v34, 0.0 }
 0x220   : > { %947 = vmatmul.bf16.gmra.mxu2 %v795_v36  ;;  %v991_v38 = vpack.c.bf16 %v966_v37, %v965_v35 }
 0x222   : > { %1107 = vmatmul.bf16.gmra.mxu3 %v991_v38 }
 0x223   : > { %v908_v39 = vpop.f32.mrf.mxu2 }
 0x224   : > { %v909_v40 = vadd.f32 %v1676_v3, %v908_v39 }
 0x226   : > { %v967_v44 = vmax.f32 %v909_v40, 0.0 }
 0x22b   : > { %v910_v42 = vpop.f32.mrf.mxu2 }
 0x22c   : > { %v911_v43 = vadd.f32 %v1676_v3, %v910_v42 }
 0x22e   : > { %v968_v7 = vmax.f32 %v911_v43, 0.0 }
 0x230   : > { %v992_v45 = vpack.c.bf16 %v968_v7, %v967_v44 }
 0x232   : > { %1112 = vmatmul.bf16.gmra.mxu3 %v992_v45 }
 0x233   : > { %v913_v46 = vpop.f32.mrf.mxu2 }
 0x234   : > { %v914_v47 = vadd.f32 %v1676_v3, %v913_v46 }
 0x236   : > { %v969_v50 = vmax.f32 %v914_v47, 0.0 }
 0x23b   : > { %v915_v48 = vpop.f32.mrf.mxu2 }
 0x23c   : > { %v916_v49 = vadd.f32 %v1676_v3, %v915_v48 }
 0x23e   : > { %v970_v41 = vmax.f32 %v916_v49, 0.0 }
 0x240   : > { %v993_v51 = vpack.c.bf16 %v970_v41, %v969_v50 }
 0x242   : > { %1117 = vmatmul.bf16.gmra.mxu3 %v993_v51 }
 0x243   : > { %v918_v53 = vpop.f32.mrf.mxu2 }
 0x244   : > { %v919_v56 = vadd.f32 %v1676_v3, %v918_v53 }
 0x245   : > { %v1078_v54 = vpop.f32.mrf.mxu3 }
 0x246   : > { %v1079_v55 = vadd.f32 %v1713_v52, %v1078_v54  ;;  %v971_v60 = vmax.f32 %v919_v56, 0.0 }
 0x248   : > { %1159 = vst.msk [vmem:[%s1720_s25] sm:$0xff] %vm1158_vm2, %v1079_v55 }
 0x24b   : > { %v920_v57 = vpop.f32.mrf.mxu2 }
 0x24c   : > { %v921_v58 = vadd.f32 %v1676_v3, %v920_v57 }
 0x24d   : > { %v1080_v59 = vpop.f32.mrf.mxu3 }
 0x24e   : > { %v972_v61 = vmax.f32 %v921_v58, 0.0  ;;  %v1081_v62 = vadd.f32 %v1713_v52, %v1080_v59 }
 0x250   : > { %1160 = vst.msk [vmem:[%s1720_s25 + $0x8] sm:$0xff] %vm1158_vm2, %v1081_v62  ;;  %v994_v63 = vpack.c.bf16 %v972_v61, %v971_v60 }
 0x252   : > { %1122 = vmatmul.bf16.gmra.mxu3 %v994_v63 }
 0x253   : > { %v923_v0 = vpop.f32.mrf.mxu2 }
 0x254   : > { %v924_v4 = vadd.f32 %v1676_v3, %v923_v0 }
 0x255   : > { %v1083_v1 = vpop.f32.mrf.mxu3 }
 0x256   : > { %v1084_v2 = vadd.f32 %v1713_v52, %v1083_v1  ;;  %v973_v9 = vmax.f32 %v924_v4, 0.0 }
 0x258   : > { %1161 = vst.msk [vmem:[%s1720_s25 + $0x10] sm:$0xff] %vm1158_vm2, %v1084_v2 }
 0x25b   : > { %v925_v5 = vpop.f32.mrf.mxu2 }
 0x25c   : > { %v926_v6 = vadd.f32 %v1676_v3, %v925_v5 }
 0x25d   : > { %v1085_v8 = vpop.f32.mrf.mxu3 }
 0x25e   : > { %v974_v10 = vmax.f32 %v926_v6, 0.0  ;;  %v1086_v11 = vadd.f32 %v1713_v52, %v1085_v8 }
 0x260   : > { %1162 = vst.msk [vmem:[%s1720_s25 + $0x18] sm:$0xff] %vm1158_vm2, %v1086_v11  ;;  %v995_v12 = vpack.c.bf16 %v974_v10, %v973_v9 }
 0x262   : > { %1127 = vmatmul.bf16.gmra.mxu3 %v995_v12 }
 0x263   : > { %v928_v13 = vpop.f32.mrf.mxu2 }
 0x264   : > { %v929_v16 = vadd.f32 %v1676_v3, %v928_v13 }
 0x265   : > { %v1088_v14 = vpop.f32.mrf.mxu3 }
 0x266   : > { %v1089_v15 = vadd.f32 %v1713_v52, %v1088_v14  ;;  %v975_v20 = vmax.f32 %v929_v16, 0.0 }
 0x268   : > { %1163 = vst.msk [vmem:[%s1720_s25 + $0x20] sm:$0xff] %vm1158_vm2, %v1089_v15 }
 0x26b   : > { %v930_v17 = vpop.f32.mrf.mxu2 }
 0x26c   : > { %v931_v18 = vadd.f32 %v1676_v3, %v930_v17 }
 0x26d   : > { %v1090_v19 = vpop.f32.mrf.mxu3 }
 0x26e   : > { %v976_v21 = vmax.f32 %v931_v18, 0.0  ;;  %v1091_v22 = vadd.f32 %v1713_v52, %v1090_v19 }
 0x270   : > { %1164 = vst.msk [vmem:[%s1720_s25 + $0x28] sm:$0xff] %vm1158_vm2, %v1091_v22  ;;  %v996_v23 = vpack.c.bf16 %v976_v21, %v975_v20 }
 0x272   : > { %1132 = vmatmul.bf16.gmra.mxu3 %v996_v23 }
 0x273   : > { %v933_v24 = vpop.f32.mrf.mxu2 }
 0x274   : > { %v934_v27 = vadd.f32 %v1676_v3, %v933_v24 }
 0x275   : > { %v1093_v25 = vpop.f32.mrf.mxu3 }
 0x276   : > { %v1094_v26 = vadd.f32 %v1713_v52, %v1093_v25  ;;  %v977_v31 = vmax.f32 %v934_v27, 0.0 }
 0x278   : > { %1165 = vst.msk [vmem:[%s1720_s25 + $0x30] sm:$0xff] %vm1158_vm2, %v1094_v26 }
 0x27b   : > { %v935_v28 = vpop.f32.mrf.mxu2 }
 0x27c   : > { %v936_v29 = vadd.f32 %v1676_v3, %v935_v28 }
 0x27d   : > { %v1095_v30 = vpop.f32.mrf.mxu3 }
 0x27e   : > { %v978_v32 = vmax.f32 %v936_v29, 0.0  ;;  %v1096_v33 = vadd.f32 %v1713_v52, %v1095_v30 }
 0x280   : > { %v997_v34 = vpack.c.bf16 %v978_v32, %v977_v31  ;;  %1166 = vst.msk [vmem:[%s1720_s25 + $0x38] sm:$0xff] %vm1158_vm2, %v1096_v33 }
 0x282   : > { %1137 = vmatmul.bf16.gmra.mxu3 %v997_v34 }
 0x283   : > { %v938_v35 = vpop.f32.mrf.mxu2 }
 0x284   : > { %v939_v38 = vadd.f32 %v1676_v3, %v938_v35 }
 0x285   : > { %v1098_v36 = vpop.f32.mrf.mxu3 }
 0x286   : > { %v1099_v37 = vadd.f32 %v1713_v52, %v1098_v36  ;;  %v979_v43 = vmax.f32 %v939_v38, 0.0 }
 0x288   : > { %1167 = vst.msk [vmem:[%s1720_s25 + $0x40] sm:$0xff] %vm1158_vm2, %v1099_v37 }
 0x28b   : > { %v940_v39 = vpop.f32.mrf.mxu2 }
 0x28c   : > { %v941_v40 = vadd.f32 %v1676_v3, %v940_v39 }
 0x28d   : > { %v1100_v42 = vpop.f32.mrf.mxu3 }
 0x28e   : > { %v980_v44 = vmax.f32 %v941_v40, 0.0  ;;  %v1101_v7 = vadd.f32 %v1713_v52, %v1100_v42 }
 0x290   : > { %v998_v45 = vpack.c.bf16 %v980_v44, %v979_v43  ;;  %1168 = vst.msk [vmem:[%s1720_s25 + $0x48] sm:$0xff] %vm1158_vm2, %v1101_v7 }
 0x292   : > { %1142 = vmatmul.bf16.gmra.mxu3 %v998_v45 }
 0x293   : > { %v943_v46 = vpop.f32.mrf.mxu2 }
 0x294   : > { %v944_v49 = vadd.f32 %v1676_v3, %v943_v46 }
 0x295   : > { %v1103_v47 = vpop.f32.mrf.mxu3 }
 0x296   : > { %v1104_v48 = vadd.f32 %v1713_v52, %v1103_v47  ;;  %v981_v53 = vmax.f32 %v944_v49, 0.0 }
 0x298   : > { %1169 = vst.msk [vmem:[%s1720_s25 + $0x50] sm:$0xff] %vm1158_vm2, %v1104_v48 }
 0x29b   : > { %v945_v50 = vpop.f32.mrf.mxu2 }
 0x29c   : > { %v946_v41 = vadd.f32 %v1676_v3, %v945_v50 }
 0x29d   : > { %v1105_v51 = vpop.f32.mrf.mxu3 }
 0x29e   : > { %v982_v54 = vmax.f32 %v946_v41, 0.0  ;;  %v1106_v55 = vadd.f32 %v1713_v52, %v1105_v51 }
 0x2a0   : > { %v999_v56 = vpack.c.bf16 %v982_v54, %v981_v53  ;;  %1170 = vst.msk [vmem:[%s1720_s25 + $0x58] sm:$0xff] %vm1158_vm2, %v1106_v55 }
 0x2a2   : > { %1147 = vmatmul.bf16.gmra.mxu3 %v999_v56 }
 0x2a3   : > { %v948_v57 = vpop.f32.mrf.mxu2 }
 0x2a4   : > { %v949_v60 = vadd.f32 %v1676_v3, %v948_v57 }
 0x2a5   : > { %v1108_v58 = vpop.f32.mrf.mxu3 }
 0x2a6   : > { %v1109_v59 = vadd.f32 %v1713_v52, %v1108_v58  ;;  %v983_v0 = vmax.f32 %v949_v60, 0.0 }
 0x2a8   : > { %1171 = vst.msk [vmem:[%s1720_s25 + $0x60] sm:$0xff] %vm1158_vm2, %v1109_v59 }
 0x2ab   : > { %v950_v61 = vpop.f32.mrf.mxu2 }
 0x2ac   : > { %v951_v62 = vadd.f32 %v1676_v3, %v950_v61 }
 0x2ad   : > { %v1110_v63 = vpop.f32.mrf.mxu3 }
 0x2ae   : > { %v984_v1 = vmax.f32 %v951_v62, 0.0  ;;  %v1111_v2 = vadd.f32 %v1713_v52, %v1110_v63 }
 0x2b0   : > { %v1000_v4 = vpack.c.bf16 %v984_v1, %v983_v0  ;;  %1172 = vst.msk [vmem:[%s1720_s25 + $0x68] sm:$0xff] %vm1158_vm2, %v1111_v2 }
 0x2b2   : > { %1152 = vmatmul.bf16.gmra.mxu3 %v1000_v4 }
 0x2b5   : > { %v1113_v5 = vpop.f32.mrf.mxu3 }
 0x2b6   : > { %v1114_v6 = vadd.f32 %v1713_v52, %v1113_v5 }
 0x2b8   : > { %1173 = vst.msk [vmem:[%s1720_s25 + $0x70] sm:$0xff] %vm1158_vm2, %v1114_v6 }
 0x2bd   : > { %v1115_v8 = vpop.f32.mrf.mxu3 }
 0x2be   : > { %v1116_v3 = vadd.f32 %v1713_v52, %v1115_v8 }
 0x2c0   : > { %1174 = vst.msk [vmem:[%s1720_s25 + $0x78] sm:$0xff] %vm1158_vm2, %v1116_v3 }
 0x2c5   : > { %v1118_v9 = vpop.f32.mrf.mxu3 }
 0x2c6   : > { %v1119_v10 = vadd.f32 %v1713_v52, %v1118_v9 }
 0x2c8   : > { %1175 = vst.msk [vmem:[%s1720_s25 + $0x80] sm:$0xff] %vm1158_vm2, %v1119_v10 }
 0x2cd   : > { %v1120_v11 = vpop.f32.mrf.mxu3 }
 0x2ce   : > { %v1121_v12 = vadd.f32 %v1713_v52, %v1120_v11 }
 0x2d0   : > { %1176 = vst.msk [vmem:[%s1720_s25 + $0x88] sm:$0xff] %vm1158_vm2, %v1121_v12 }
 0x2d5   : > { %v1123_v13 = vpop.f32.mrf.mxu3 }
 0x2d6   : > { %v1124_v14 = vadd.f32 %v1713_v52, %v1123_v13 }
 0x2d8   : > { %1177 = vst.msk [vmem:[%s1720_s25 + $0x90] sm:$0xff] %vm1158_vm2, %v1124_v14 }
 0x2dd   : > { %v1125_v15 = vpop.f32.mrf.mxu3 }
 0x2de   : > { %v1126_v16 = vadd.f32 %v1713_v52, %v1125_v15 }
 0x2e0   : > { %1178 = vst.msk [vmem:[%s1720_s25 + $0x98] sm:$0xff] %vm1158_vm2, %v1126_v16 }
 0x2e5   : > { %v1128_v17 = vpop.f32.mrf.mxu3 }
 0x2e6   : > { %v1129_v18 = vadd.f32 %v1713_v52, %v1128_v17 }
 0x2e8   : > { %1179 = vst.msk [vmem:[%s1720_s25 + $0xa0] sm:$0xff] %vm1158_vm2, %v1129_v18 }
 0x2ed   : > { %v1130_v19 = vpop.f32.mrf.mxu3 }
 0x2ee   : > { %v1131_v20 = vadd.f32 %v1713_v52, %v1130_v19 }
 0x2f0   : > { %1180 = vst.msk [vmem:[%s1720_s25 + $0xa8] sm:$0xff] %vm1158_vm2, %v1131_v20 }
 0x2f5   : > { %v1133_v21 = vpop.f32.mrf.mxu3 }
 0x2f6   : > { %v1134_v22 = vadd.f32 %v1713_v52, %v1133_v21 }
 0x2f8   : > { %1181 = vst.msk [vmem:[%s1720_s25 + $0xb0] sm:$0xff] %vm1158_vm2, %v1134_v22 }
 0x2fd   : > { %v1135_v23 = vpop.f32.mrf.mxu3 }
 0x2fe   : > { %v1136_v24 = vadd.f32 %v1713_v52, %v1135_v23 }
 0x300   : > { %1182 = vst.msk [vmem:[%s1720_s25 + $0xb8] sm:$0xff] %vm1158_vm2, %v1136_v24 }
 0x305   : > { %v1138_v25 = vpop.f32.mrf.mxu3 }
 0x306   : > { %v1139_v26 = vadd.f32 %v1713_v52, %v1138_v25 }
 0x308   : > { %1183 = vst.msk [vmem:[%s1720_s25 + $0xc0] sm:$0xff] %vm1158_vm2, %v1139_v26 }
 0x30d   : > { %v1140_v27 = vpop.f32.mrf.mxu3 }
 0x30e   : > { %v1141_v28 = vadd.f32 %v1713_v52, %v1140_v27 }
 0x310   : > { %1184 = vst.msk [vmem:[%s1720_s25 + $0xc8] sm:$0xff] %vm1158_vm2, %v1141_v28 }
 0x315   : > { %v1143_v29 = vpop.f32.mrf.mxu3 }
 0x316   : > { %v1144_v30 = vadd.f32 %v1713_v52, %v1143_v29 }
 0x318   : > { %1185 = vst.msk [vmem:[%s1720_s25 + $0xd0] sm:$0xff] %vm1158_vm2, %v1144_v30 }
 0x31d   : > { %v1145_v31 = vpop.f32.mrf.mxu3 }
 0x31e   : > { %v1146_v32 = vadd.f32 %v1713_v52, %v1145_v31 }
 0x320   : > { %1186 = vst.msk [vmem:[%s1720_s25 + $0xd8] sm:$0xff] %vm1158_vm2, %v1146_v32 }
 0x325   : > { %v1148_v33 = vpop.f32.mrf.mxu3 }
 0x326   : > { %v1149_v34 = vadd.f32 %v1713_v52, %v1148_v33 }
 0x328   : > { %1187 = vst.msk [vmem:[%s1720_s25 + $0xe0] sm:$0xff] %vm1158_vm2, %v1149_v34 }
 0x32d   : > { %v1150_v35 = vpop.f32.mrf.mxu3 }
 0x32e   : > { %v1151_v36 = vadd.f32 %v1713_v52, %v1150_v35 }
 0x330   : > { %1188 = vst.msk [vmem:[%s1720_s25 + $0xe8] sm:$0xff] %vm1158_vm2, %v1151_v36 }
 0x335   : > { %v1153_v37 = vpop.f32.mrf.mxu3 }
 0x336   : > { %v1154_v38 = vadd.f32 %v1713_v52, %v1153_v37 }
 0x338   : > { %1189 = vst.msk [vmem:[%s1720_s25 + $0xf0] sm:$0xff] %vm1158_vm2, %v1154_v38 }
 0x33d   : > { %v1155_v39 = vpop.f32.mrf.mxu3 }
 0x33e   : > { %v1156_v40 = vadd.f32 %v1713_v52, %v1155_v39 }
 0x340   : > { %1190 = vst.msk [vmem:[%s1720_s25 + $0xf8] sm:$0xff] %vm1158_vm2, %v1156_v40 }
 0x341 PF: > { %s19_s30 = sadd.s32 1, %s1417_s30  }
 0x342   : > { %p16_p4 = scmp.ge.s32.totalorder %s19_s30, 4  }
 0x344   :  { %18 = sbr.rel (!%p16_p4) target bundleno = 1 (0x1), region = 86 }

</bundles_post_ra>
